<compile_context>
chip_gen: v5e
topology: v5e:2x2
jax: 0.10.0
libtpu: 0.0.40
codegen_flags: <defaults>
</compile_context>

<pallas_src>
import math

import jax
import jax.numpy as jnp
from jax.experimental import pallas as pl
from jax.experimental.pallas import tpu as pltpu


# ---------------------------------------------------------------------------
# Fused Pallas kernel
# ---------------------------------------------------------------------------

def _make_fused_kernel(S, B, F, H, num_layers):
    """Builds the fused temp_att_net kernel for static (S, B, F, H, L)."""

    def kernel(*refs):
        # ref layout:
        #   [0]            x         (S*B, F)    time-major rows
        #   [1 : 1+3L]     per layer: w_ih_cat (F_in,2H), w_hh_blk (2H,2H),
        #                             b_cat (1,2H)
        #   [1+3L]         w_fc      (1, 2H)
        #   [2+3L]         b_fc      (1, 1)
        #   [3+3L]         out       (S*B, 1)
        x_ref = refs[0]
        w_refs = refs[1:1 + 3 * num_layers]
        w_fc_ref = refs[1 + 3 * num_layers]
        b_fc_ref = refs[2 + 3 * num_layers]
        out_ref = refs[3 + 3 * num_layers]

        cur = x_ref[...]  # (S*B, F_in) current layer input, in registers

        # Hoisted lane masks: lanes [0, H) carry the forward direction,
        # lanes [H, 2H) the backward direction (built once, reused per layer).
        fwd_mask_step = jax.lax.broadcasted_iota(jnp.int32, (B, 2 * H), 1) < H
        fwd_mask_full = jax.lax.broadcasted_iota(jnp.int32, (S * B, 2 * H), 1) < H

        for l in range(num_layers):
            w_ih = w_refs[3 * l + 0][...]   # (F_in, 2H)  [wih_f | wih_b]
            w_hh = w_refs[3 * l + 1][...]   # (2H, 2H)    block-diag(whh_f, whh_b)
            b = w_refs[3 * l + 2][...]      # (1, 2H)     [b_f | b_b]

            # Hoisted fused input projection for BOTH directions (no sequential
            # dependency): one (S*B, F_in) @ (F_in, 2H) MXU matmul per layer.
            z = jnp.dot(cur, w_ih, preferred_element_type=jnp.float32) + b

            # Fused fwd/bwd recurrence.  h[:, :H] is the forward hidden at time
            # t, h[:, H:] is the backward hidden at time S-1-t; the block-
            # diagonal w_hh keeps the two halves independent, so ONE matmul and
            # ONE tanh per step on the critical path.
            h = jnp.zeros((B, 2 * H), jnp.float32)
            h_steps = []
            for t in range(S):                       # unrolled: S small & static
                tb = S - 1 - t
                # forward half of z at time t, backward half at time S-1-t;
                # both halves already sit at their target lanes -> pure select.
                z_step = jnp.where(fwd_mask_step,
                                   z[t * B:(t + 1) * B, :],
                                   z[tb * B:(tb + 1) * B, :])
                h = jnp.tanh(z_step +
                             jnp.dot(h, w_hh, preferred_element_type=jnp.float32))
                h_steps.append(h)

            # Assemble the layer output (S*B, 2H) entirely in vregs:
            #   forward halves are already in time order; backward halves are in
            #   reversed time order -> reverse the step list and lane-select.
            y_f = jnp.concatenate(h_steps, axis=0)        # fwd halves correct
            y_b = jnp.concatenate(h_steps[::-1], axis=0)  # bwd halves correct
            cur = jnp.where(fwd_mask_full, y_f, y_b)      # (S*B, 2H)

        # Saliency head: per-row multiply + lane reduction (VPU/XLU) instead of
        # an (N,2H)@(2H,1) MXU pass; sigmoid via the stable tanh identity (EUP).
        logits = (jnp.sum(cur * w_fc_ref[...], axis=-1, keepdims=True)
                  + b_fc_ref[...])
        out_ref[...] = 0.5 * (jnp.tanh(0.5 * logits) + 1.0)

    return kernel


# ---------------------------------------------------------------------------
# Wrapper (jitted: param packing + reshape + pallas_call in one executable)
# ---------------------------------------------------------------------------

def _pack_layer(layer, H):
    """Pack one bidirectional layer into fused-direction weights."""
    (w_ih_f, w_hh_f, b_f), (w_ih_b, w_hh_b, b_b) = layer
    w_ih_cat = jnp.concatenate([w_ih_f, w_ih_b], axis=1)            # (F_in, 2H)
    zeros = jnp.zeros((H, H), jnp.float32)
    w_hh_blk = jnp.concatenate(
        [jnp.concatenate([w_hh_f, zeros], axis=1),
         jnp.concatenate([zeros, w_hh_b], axis=1)], axis=0)          # (2H, 2H)
    b_cat = jnp.concatenate([b_f, b_b], axis=1)                      # (1, 2H)
    return w_ih_cat, w_hh_blk, b_cat


@jax.jit
def temp_att_net_forward(x, rnn_params, fc_params):
    """Full forward pass of temp_att_net.

    x          : (S, B, input_size) float32
    rnn_params : list over layers; each layer is [fwd, bwd] with
                 (w_ih (F_in,H), w_hh (H,H), bias (1,H))  [bias = b_ih + b_hh]
    fc_params  : (w_fc (1, 2H), b_fc (1, 1))
    returns    : (S, B) attention in [0, 1]
    """
    S, B, F = x.shape
    num_layers = len(rnn_params)
    assert all(len(layer) == 2 for layer in rnn_params), "bidirectional only"
    H = rnn_params[0][0][1].shape[0]
    w_fc, b_fc = fc_params

    flat_w = []
    for layer in rnn_params:
        flat_w += list(_pack_layer(layer, H))
    inputs = [x.reshape(S * B, F)] + flat_w + [w_fc, b_fc]

    kernel = _make_fused_kernel(S, B, F, H, num_layers)
    out = pl.pallas_call(
        kernel,
        out_shape=jax.ShapeDtypeStruct((S * B, 1), jnp.float32),
        in_specs=[pl.BlockSpec(memory_space=pltpu.MemorySpace.VMEM)] * len(inputs),
        out_specs=pl.BlockSpec(memory_space=pltpu.MemorySpace.VMEM),
    )(*inputs)
    return out.reshape(S, B)


# ---------------------------------------------------------------------------
# Pure-JAX reference (matches PyTorch nn.RNN + Linear + Sigmoid semantics)
# ---------------------------------------------------------------------------

def temp_att_net_reference(x, rnn_params, fc_params):
    layer_in = x  # (S, B, F)
    for layer in rnn_params:
        outs = []
        for d, (w_ih, w_hh, b) in enumerate(layer):
            xs = layer_in if d == 0 else layer_in[::-1]

            def step(h, x_t, w_ih=w_ih, w_hh=w_hh, b=b):
                h = jnp.tanh(x_t @ w_ih + h @ w_hh + b)
                return h, h

            h0 = jnp.zeros((layer_in.shape[1], w_hh.shape[0]), jnp.float32)
            _, ys = jax.lax.scan(step, h0, xs)
            if d == 1:
                ys = ys[::-1]
            outs.append(ys)
        layer_in = jnp.concatenate(outs, axis=-1)  # (S, B, 2H)
    w_fc, b_fc = fc_params
    logits = jnp.sum(layer_in * w_fc[None, :, :], axis=-1) + b_fc[0, 0]
    return jax.nn.sigmoid(logits)  # (S, B)


# ---------------------------------------------------------------------------
# Deterministic parameter init (shapes per nn.RNN / nn.Linear __init__)
# ---------------------------------------------------------------------------

def init_params(key, input_size, hidden_size, num_layers, bidirectional=True):
    D = 2 if bidirectional else 1
    stdv = 1.0 / math.sqrt(hidden_size)
    rnn_params = []
    for layer in range(num_layers):
        in_feat = input_size if layer == 0 else hidden_size * D
        dirs = []
        for _ in range(D):
            key, k1, k2, k3, k4 = jax.random.split(key, 5)
            # stored transposed vs. PyTorch's (H,F)/(H,H) so kernels do x @ W
            w_ih = jax.random.uniform(k1, (in_feat, hidden_size), jnp.float32, -stdv, stdv)
            w_hh = jax.random.uniform(k2, (hidden_size, hidden_size), jnp.float32, -stdv, stdv)
            b_ih = jax.random.uniform(k3, (hidden_size,), jnp.float32, -stdv, stdv)
            b_hh = jax.random.uniform(k4, (hidden_size,), jnp.float32, -stdv, stdv)
            dirs.append((w_ih, w_hh, (b_ih + b_hh).reshape(1, hidden_size)))
        rnn_params.append(dirs)

    # saliency_evaluater.fc : Linear(hidden_size * D, 1) — stored row-vector
    fan_in = hidden_size * D
    stdv_fc = 1.0 / math.sqrt(fan_in)
    key, k1, k2 = jax.random.split(key, 3)
    w_fc = jax.random.uniform(k1, (1, fan_in), jnp.float32, -stdv_fc, stdv_fc)
    b_fc = jax.random.uniform(k2, (1, 1), jnp.float32, -stdv_fc, stdv_fc)
    return rnn_params, (w_fc, b_fc)


# ---------------------------------------------------------------------------
# Main
# ---------------------------------------------------------------------------

if __name__ == "__main__":
    input_size = 16
    hidden_size = 32
    num_layers = 2
    bidirectional = True

    S, B = 8, 2  # (seq, batch) — time-major like nn.RNN's default
    key = jax.random.PRNGKey(0)
    key, xkey = jax.random.split(key)
    x = jax.random.normal(xkey, (S, B, input_size), dtype=jnp.float32)

    rnn_params, fc_params = init_params(key, input_size, hidden_size,
                                        num_layers, bidirectional)

    attention = jax.block_until_ready(temp_att_net_forward(x, rnn_params, fc_params))
    reference = jax.block_until_ready(temp_att_net_reference(x, rnn_params, fc_params))

    assert attention.shape == (S, B), attention.shape
    assert bool(jnp.all(jnp.isfinite(attention)))
    assert bool(jnp.all((attention >= 0.0) & (attention <= 1.0)))  # sigmoid range
    max_err = float(jnp.max(jnp.abs(attention - reference)))
    assert max_err < 2e-3, f"mismatch vs reference: {max_err}"
    print("KERNEL_OK")
</pallas_src>

<mosaic_0001>
module attributes {stable_mosaic.version = 11 : i64} {
  func.func @kernel(%arg0: memref<16x16xf32, #tpu.memory_space<vmem>>, %arg1: memref<16x64xf32, #tpu.memory_space<vmem>>, %arg2: memref<64x64xf32, #tpu.memory_space<vmem>>, %arg3: memref<1x64xf32, #tpu.memory_space<vmem>>, %arg4: memref<64x64xf32, #tpu.memory_space<vmem>>, %arg5: memref<64x64xf32, #tpu.memory_space<vmem>>, %arg6: memref<1x64xf32, #tpu.memory_space<vmem>>, %arg7: memref<1x64xf32, #tpu.memory_space<vmem>>, %arg8: memref<1x1xf32, #tpu.memory_space<vmem>>, %arg9: memref<16x1xf32, #tpu.memory_space<vmem>>) attributes {dimension_semantics = [], scalar_prefetch = 0 : i64, scratch_operands = 0 : i64, tpu.core_type = #tpu.core_type<tc>} {
    %c0 = arith.constant 0 : index
    %c0_0 = arith.constant 0 : index
    %0 = vector.load %arg0[%c0, %c0_0] : memref<16x16xf32, #tpu.memory_space<vmem>>, vector<16x16xf32>
    %1 = tpu.iota {dimensions = array<i32: 1>} : vector<2x64xi32>
    %c32_i32 = arith.constant 32 : i32
    %2 = vector.broadcast %c32_i32 : i32 to vector<2x64xi32>
    %3 = arith.cmpi slt, %1, %2 : vector<2x64xi32>
    %4 = tpu.iota {dimensions = array<i32: 1>} : vector<16x64xi32>
    %c32_i32_1 = arith.constant 32 : i32
    %5 = vector.broadcast %c32_i32_1 : i32 to vector<16x64xi32>
    %6 = arith.cmpi slt, %4, %5 : vector<16x64xi32>
    %c0_2 = arith.constant 0 : index
    %c0_3 = arith.constant 0 : index
    %7 = vector.load %arg1[%c0_2, %c0_3] : memref<16x64xf32, #tpu.memory_space<vmem>>, vector<16x64xf32>
    %c0_4 = arith.constant 0 : index
    %c0_5 = arith.constant 0 : index
    %8 = vector.load %arg2[%c0_4, %c0_5] : memref<64x64xf32, #tpu.memory_space<vmem>>, vector<64x64xf32>
    %c0_6 = arith.constant 0 : index
    %c0_7 = arith.constant 0 : index
    %9 = vector.load %arg3[%c0_6, %c0_7] : memref<1x64xf32, #tpu.memory_space<vmem>>, vector<1x64xf32>
    %cst = arith.constant dense<0.000000e+00> : vector<16x64xf32>
    %10 = tpu.matmul %0, %7, %cst {dimension_numbers = #tpu.dot_dimension_numbers<[1], [0], [0], [1], [0, 0, 1, 1], [], []>} : vector<16x16xf32>, vector<16x64xf32>, vector<16x64xf32> -> vector<16x64xf32>
    %11 = vector.broadcast %9 : vector<1x64xf32> to vector<16x64xf32>
    %12 = arith.addf %10, %11 : vector<16x64xf32>
    %cst_8 = arith.constant 0.000000e+00 : f32
    %13 = vector.broadcast %cst_8 : f32 to vector<2x64xf32>
    %14 = vector.extract_strided_slice %12 {offsets = [0, 0], sizes = [2, 64], strides = [1, 1]} : vector<16x64xf32> to vector<2x64xf32>
    %15 = vector.extract_strided_slice %12 {offsets = [14, 0], sizes = [2, 64], strides = [1, 1]} : vector<16x64xf32> to vector<2x64xf32>
    %16 = arith.select %3, %14, %15 : vector<2x64xi1>, vector<2x64xf32>
    %cst_9 = arith.constant dense<0.000000e+00> : vector<2x64xf32>
    %17 = tpu.matmul %13, %8, %cst_9 {dimension_numbers = #tpu.dot_dimension_numbers<[1], [0], [0], [1], [0, 0, 1, 1], [], []>} : vector<2x64xf32>, vector<64x64xf32>, vector<2x64xf32> -> vector<2x64xf32>
    %18 = arith.addf %16, %17 : vector<2x64xf32>
    %19 = math.tanh %18 : vector<2x64xf32>
    %20 = vector.extract_strided_slice %12 {offsets = [2, 0], sizes = [2, 64], strides = [1, 1]} : vector<16x64xf32> to vector<2x64xf32>
    %21 = vector.extract_strided_slice %12 {offsets = [12, 0], sizes = [2, 64], strides = [1, 1]} : vector<16x64xf32> to vector<2x64xf32>
    %22 = arith.select %3, %20, %21 : vector<2x64xi1>, vector<2x64xf32>
    %cst_10 = arith.constant dense<0.000000e+00> : vector<2x64xf32>
    %23 = tpu.matmul %19, %8, %cst_10 {dimension_numbers = #tpu.dot_dimension_numbers<[1], [0], [0], [1], [0, 0, 1, 1], [], []>} : vector<2x64xf32>, vector<64x64xf32>, vector<2x64xf32> -> vector<2x64xf32>
    %24 = arith.addf %22, %23 : vector<2x64xf32>
    %25 = math.tanh %24 : vector<2x64xf32>
    %26 = vector.extract_strided_slice %12 {offsets = [4, 0], sizes = [2, 64], strides = [1, 1]} : vector<16x64xf32> to vector<2x64xf32>
    %27 = vector.extract_strided_slice %12 {offsets = [10, 0], sizes = [2, 64], strides = [1, 1]} : vector<16x64xf32> to vector<2x64xf32>
    %28 = arith.select %3, %26, %27 : vector<2x64xi1>, vector<2x64xf32>
    %cst_11 = arith.constant dense<0.000000e+00> : vector<2x64xf32>
    %29 = tpu.matmul %25, %8, %cst_11 {dimension_numbers = #tpu.dot_dimension_numbers<[1], [0], [0], [1], [0, 0, 1, 1], [], []>} : vector<2x64xf32>, vector<64x64xf32>, vector<2x64xf32> -> vector<2x64xf32>
    %30 = arith.addf %28, %29 : vector<2x64xf32>
    %31 = math.tanh %30 : vector<2x64xf32>
    %32 = vector.extract_strided_slice %12 {offsets = [6, 0], sizes = [2, 64], strides = [1, 1]} : vector<16x64xf32> to vector<2x64xf32>
    %33 = vector.extract_strided_slice %12 {offsets = [8, 0], sizes = [2, 64], strides = [1, 1]} : vector<16x64xf32> to vector<2x64xf32>
    %34 = arith.select %3, %32, %33 : vector<2x64xi1>, vector<2x64xf32>
    %cst_12 = arith.constant dense<0.000000e+00> : vector<2x64xf32>
    %35 = tpu.matmul %31, %8, %cst_12 {dimension_numbers = #tpu.dot_dimension_numbers<[1], [0], [0], [1], [0, 0, 1, 1], [], []>} : vector<2x64xf32>, vector<64x64xf32>, vector<2x64xf32> -> vector<2x64xf32>
    %36 = arith.addf %34, %35 : vector<2x64xf32>
    %37 = math.tanh %36 : vector<2x64xf32>
    %38 = vector.extract_strided_slice %12 {offsets = [8, 0], sizes = [2, 64], strides = [1, 1]} : vector<16x64xf32> to vector<2x64xf32>
    %39 = vector.extract_strided_slice %12 {offsets = [6, 0], sizes = [2, 64], strides = [1, 1]} : vector<16x64xf32> to vector<2x64xf32>
    %40 = arith.select %3, %38, %39 : vector<2x64xi1>, vector<2x64xf32>
    %cst_13 = arith.constant dense<0.000000e+00> : vector<2x64xf32>
    %41 = tpu.matmul %37, %8, %cst_13 {dimension_numbers = #tpu.dot_dimension_numbers<[1], [0], [0], [1], [0, 0, 1, 1], [], []>} : vector<2x64xf32>, vector<64x64xf32>, vector<2x64xf32> -> vector<2x64xf32>
    %42 = arith.addf %40, %41 : vector<2x64xf32>
    %43 = math.tanh %42 : vector<2x64xf32>
    %44 = vector.extract_strided_slice %12 {offsets = [10, 0], sizes = [2, 64], strides = [1, 1]} : vector<16x64xf32> to vector<2x64xf32>
    %45 = vector.extract_strided_slice %12 {offsets = [4, 0], sizes = [2, 64], strides = [1, 1]} : vector<16x64xf32> to vector<2x64xf32>
    %46 = arith.select %3, %44, %45 : vector<2x64xi1>, vector<2x64xf32>
    %cst_14 = arith.constant dense<0.000000e+00> : vector<2x64xf32>
    %47 = tpu.matmul %43, %8, %cst_14 {dimension_numbers = #tpu.dot_dimension_numbers<[1], [0], [0], [1], [0, 0, 1, 1], [], []>} : vector<2x64xf32>, vector<64x64xf32>, vector<2x64xf32> -> vector<2x64xf32>
    %48 = arith.addf %46, %47 : vector<2x64xf32>
    %49 = math.tanh %48 : vector<2x64xf32>
    %50 = vector.extract_strided_slice %12 {offsets = [12, 0], sizes = [2, 64], strides = [1, 1]} : vector<16x64xf32> to vector<2x64xf32>
    %51 = vector.extract_strided_slice %12 {offsets = [2, 0], sizes = [2, 64], strides = [1, 1]} : vector<16x64xf32> to vector<2x64xf32>
    %52 = arith.select %3, %50, %51 : vector<2x64xi1>, vector<2x64xf32>
    %cst_15 = arith.constant dense<0.000000e+00> : vector<2x64xf32>
    %53 = tpu.matmul %49, %8, %cst_15 {dimension_numbers = #tpu.dot_dimension_numbers<[1], [0], [0], [1], [0, 0, 1, 1], [], []>} : vector<2x64xf32>, vector<64x64xf32>, vector<2x64xf32> -> vector<2x64xf32>
    %54 = arith.addf %52, %53 : vector<2x64xf32>
    %55 = math.tanh %54 : vector<2x64xf32>
    %56 = vector.extract_strided_slice %12 {offsets = [14, 0], sizes = [2, 64], strides = [1, 1]} : vector<16x64xf32> to vector<2x64xf32>
    %57 = vector.extract_strided_slice %12 {offsets = [0, 0], sizes = [2, 64], strides = [1, 1]} : vector<16x64xf32> to vector<2x64xf32>
    %58 = arith.select %3, %56, %57 : vector<2x64xi1>, vector<2x64xf32>
    %cst_16 = arith.constant dense<0.000000e+00> : vector<2x64xf32>
    %59 = tpu.matmul %55, %8, %cst_16 {dimension_numbers = #tpu.dot_dimension_numbers<[1], [0], [0], [1], [0, 0, 1, 1], [], []>} : vector<2x64xf32>, vector<64x64xf32>, vector<2x64xf32> -> vector<2x64xf32>
    %60 = arith.addf %58, %59 : vector<2x64xf32>
    %61 = math.tanh %60 : vector<2x64xf32>
    %62 = tpu.concatenate %19, %25, %31, %37, %43, %49, %55, %61 in 0 : vector<2x64xf32>, vector<2x64xf32>, vector<2x64xf32>, vector<2x64xf32>, vector<2x64xf32>, vector<2x64xf32>, vector<2x64xf32>, vector<2x64xf32> -> vector<16x64xf32>
    %63 = tpu.concatenate %61, %55, %49, %43, %37, %31, %25, %19 in 0 : vector<2x64xf32>, vector<2x64xf32>, vector<2x64xf32>, vector<2x64xf32>, vector<2x64xf32>, vector<2x64xf32>, vector<2x64xf32>, vector<2x64xf32> -> vector<16x64xf32>
    %64 = arith.select %6, %62, %63 : vector<16x64xi1>, vector<16x64xf32>
    %c0_17 = arith.constant 0 : index
    %c0_18 = arith.constant 0 : index
    %65 = vector.load %arg4[%c0_17, %c0_18] : memref<64x64xf32, #tpu.memory_space<vmem>>, vector<64x64xf32>
    %c0_19 = arith.constant 0 : index
    %c0_20 = arith.constant 0 : index
    %66 = vector.load %arg5[%c0_19, %c0_20] : memref<64x64xf32, #tpu.memory_space<vmem>>, vector<64x64xf32>
    %c0_21 = arith.constant 0 : index
    %c0_22 = arith.constant 0 : index
    %67 = vector.load %arg6[%c0_21, %c0_22] : memref<1x64xf32, #tpu.memory_space<vmem>>, vector<1x64xf32>
    %cst_23 = arith.constant dense<0.000000e+00> : vector<16x64xf32>
    %68 = tpu.matmul %64, %65, %cst_23 {dimension_numbers = #tpu.dot_dimension_numbers<[1], [0], [0], [1], [0, 0, 1, 1], [], []>} : vector<16x64xf32>, vector<64x64xf32>, vector<16x64xf32> -> vector<16x64xf32>
    %69 = vector.broadcast %67 : vector<1x64xf32> to vector<16x64xf32>
    %70 = arith.addf %68, %69 : vector<16x64xf32>
    %cst_24 = arith.constant 0.000000e+00 : f32
    %71 = vector.broadcast %cst_24 : f32 to vector<2x64xf32>
    %72 = vector.extract_strided_slice %70 {offsets = [0, 0], sizes = [2, 64], strides = [1, 1]} : vector<16x64xf32> to vector<2x64xf32>
    %73 = vector.extract_strided_slice %70 {offsets = [14, 0], sizes = [2, 64], strides = [1, 1]} : vector<16x64xf32> to vector<2x64xf32>
    %74 = arith.select %3, %72, %73 : vector<2x64xi1>, vector<2x64xf32>
    %cst_25 = arith.constant dense<0.000000e+00> : vector<2x64xf32>
    %75 = tpu.matmul %71, %66, %cst_25 {dimension_numbers = #tpu.dot_dimension_numbers<[1], [0], [0], [1], [0, 0, 1, 1], [], []>} : vector<2x64xf32>, vector<64x64xf32>, vector<2x64xf32> -> vector<2x64xf32>
    %76 = arith.addf %74, %75 : vector<2x64xf32>
    %77 = math.tanh %76 : vector<2x64xf32>
    %78 = vector.extract_strided_slice %70 {offsets = [2, 0], sizes = [2, 64], strides = [1, 1]} : vector<16x64xf32> to vector<2x64xf32>
    %79 = vector.extract_strided_slice %70 {offsets = [12, 0], sizes = [2, 64], strides = [1, 1]} : vector<16x64xf32> to vector<2x64xf32>
    %80 = arith.select %3, %78, %79 : vector<2x64xi1>, vector<2x64xf32>
    %cst_26 = arith.constant dense<0.000000e+00> : vector<2x64xf32>
    %81 = tpu.matmul %77, %66, %cst_26 {dimension_numbers = #tpu.dot_dimension_numbers<[1], [0], [0], [1], [0, 0, 1, 1], [], []>} : vector<2x64xf32>, vector<64x64xf32>, vector<2x64xf32> -> vector<2x64xf32>
    %82 = arith.addf %80, %81 : vector<2x64xf32>
    %83 = math.tanh %82 : vector<2x64xf32>
    %84 = vector.extract_strided_slice %70 {offsets = [4, 0], sizes = [2, 64], strides = [1, 1]} : vector<16x64xf32> to vector<2x64xf32>
    %85 = vector.extract_strided_slice %70 {offsets = [10, 0], sizes = [2, 64], strides = [1, 1]} : vector<16x64xf32> to vector<2x64xf32>
    %86 = arith.select %3, %84, %85 : vector<2x64xi1>, vector<2x64xf32>
    %cst_27 = arith.constant dense<0.000000e+00> : vector<2x64xf32>
    %87 = tpu.matmul %83, %66, %cst_27 {dimension_numbers = #tpu.dot_dimension_numbers<[1], [0], [0], [1], [0, 0, 1, 1], [], []>} : vector<2x64xf32>, vector<64x64xf32>, vector<2x64xf32> -> vector<2x64xf32>
    %88 = arith.addf %86, %87 : vector<2x64xf32>
    %89 = math.tanh %88 : vector<2x64xf32>
    %90 = vector.extract_strided_slice %70 {offsets = [6, 0], sizes = [2, 64], strides = [1, 1]} : vector<16x64xf32> to vector<2x64xf32>
    %91 = vector.extract_strided_slice %70 {offsets = [8, 0], sizes = [2, 64], strides = [1, 1]} : vector<16x64xf32> to vector<2x64xf32>
    %92 = arith.select %3, %90, %91 : vector<2x64xi1>, vector<2x64xf32>
    %cst_28 = arith.constant dense<0.000000e+00> : vector<2x64xf32>
    %93 = tpu.matmul %89, %66, %cst_28 {dimension_numbers = #tpu.dot_dimension_numbers<[1], [0], [0], [1], [0, 0, 1, 1], [], []>} : vector<2x64xf32>, vector<64x64xf32>, vector<2x64xf32> -> vector<2x64xf32>
    %94 = arith.addf %92, %93 : vector<2x64xf32>
    %95 = math.tanh %94 : vector<2x64xf32>
    %96 = vector.extract_strided_slice %70 {offsets = [8, 0], sizes = [2, 64], strides = [1, 1]} : vector<16x64xf32> to vector<2x64xf32>
    %97 = vector.extract_strided_slice %70 {offsets = [6, 0], sizes = [2, 64], strides = [1, 1]} : vector<16x64xf32> to vector<2x64xf32>
    %98 = arith.select %3, %96, %97 : vector<2x64xi1>, vector<2x64xf32>
    %cst_29 = arith.constant dense<0.000000e+00> : vector<2x64xf32>
    %99 = tpu.matmul %95, %66, %cst_29 {dimension_numbers = #tpu.dot_dimension_numbers<[1], [0], [0], [1], [0, 0, 1, 1], [], []>} : vector<2x64xf32>, vector<64x64xf32>, vector<2x64xf32> -> vector<2x64xf32>
    %100 = arith.addf %98, %99 : vector<2x64xf32>
    %101 = math.tanh %100 : vector<2x64xf32>
    %102 = vector.extract_strided_slice %70 {offsets = [10, 0], sizes = [2, 64], strides = [1, 1]} : vector<16x64xf32> to vector<2x64xf32>
    %103 = vector.extract_strided_slice %70 {offsets = [4, 0], sizes = [2, 64], strides = [1, 1]} : vector<16x64xf32> to vector<2x64xf32>
    %104 = arith.select %3, %102, %103 : vector<2x64xi1>, vector<2x64xf32>
    %cst_30 = arith.constant dense<0.000000e+00> : vector<2x64xf32>
    %105 = tpu.matmul %101, %66, %cst_30 {dimension_numbers = #tpu.dot_dimension_numbers<[1], [0], [0], [1], [0, 0, 1, 1], [], []>} : vector<2x64xf32>, vector<64x64xf32>, vector<2x64xf32> -> vector<2x64xf32>
    %106 = arith.addf %104, %105 : vector<2x64xf32>
    %107 = math.tanh %106 : vector<2x64xf32>
    %108 = vector.extract_strided_slice %70 {offsets = [12, 0], sizes = [2, 64], strides = [1, 1]} : vector<16x64xf32> to vector<2x64xf32>
    %109 = vector.extract_strided_slice %70 {offsets = [2, 0], sizes = [2, 64], strides = [1, 1]} : vector<16x64xf32> to vector<2x64xf32>
    %110 = arith.select %3, %108, %109 : vector<2x64xi1>, vector<2x64xf32>
    %cst_31 = arith.constant dense<0.000000e+00> : vector<2x64xf32>
    %111 = tpu.matmul %107, %66, %cst_31 {dimension_numbers = #tpu.dot_dimension_numbers<[1], [0], [0], [1], [0, 0, 1, 1], [], []>} : vector<2x64xf32>, vector<64x64xf32>, vector<2x64xf32> -> vector<2x64xf32>
    %112 = arith.addf %110, %111 : vector<2x64xf32>
    %113 = math.tanh %112 : vector<2x64xf32>
    %114 = vector.extract_strided_slice %70 {offsets = [14, 0], sizes = [2, 64], strides = [1, 1]} : vector<16x64xf32> to vector<2x64xf32>
    %115 = vector.extract_strided_slice %70 {offsets = [0, 0], sizes = [2, 64], strides = [1, 1]} : vector<16x64xf32> to vector<2x64xf32>
    %116 = arith.select %3, %114, %115 : vector<2x64xi1>, vector<2x64xf32>
    %cst_32 = arith.constant dense<0.000000e+00> : vector<2x64xf32>
    %117 = tpu.matmul %113, %66, %cst_32 {dimension_numbers = #tpu.dot_dimension_numbers<[1], [0], [0], [1], [0, 0, 1, 1], [], []>} : vector<2x64xf32>, vector<64x64xf32>, vector<2x64xf32> -> vector<2x64xf32>
    %118 = arith.addf %116, %117 : vector<2x64xf32>
    %119 = math.tanh %118 : vector<2x64xf32>
    %120 = tpu.concatenate %77, %83, %89, %95, %101, %107, %113, %119 in 0 : vector<2x64xf32>, vector<2x64xf32>, vector<2x64xf32>, vector<2x64xf32>, vector<2x64xf32>, vector<2x64xf32>, vector<2x64xf32>, vector<2x64xf32> -> vector<16x64xf32>
    %121 = tpu.concatenate %119, %113, %107, %101, %95, %89, %83, %77 in 0 : vector<2x64xf32>, vector<2x64xf32>, vector<2x64xf32>, vector<2x64xf32>, vector<2x64xf32>, vector<2x64xf32>, vector<2x64xf32>, vector<2x64xf32> -> vector<16x64xf32>
    %122 = arith.select %6, %120, %121 : vector<16x64xi1>, vector<16x64xf32>
    %c0_33 = arith.constant 0 : index
    %c0_34 = arith.constant 0 : index
    %123 = vector.load %arg7[%c0_33, %c0_34] : memref<1x64xf32, #tpu.memory_space<vmem>>, vector<1x64xf32>
    %124 = vector.broadcast %123 : vector<1x64xf32> to vector<16x64xf32>
    %125 = arith.mulf %122, %124 : vector<16x64xf32>
    %cst_35 = arith.constant dense<0.000000e+00> : vector<16xf32>
    %126 = vector.multi_reduction <add>, %125, %cst_35 [1] : vector<16x64xf32> to vector<16xf32>
    %127 = vector.shape_cast %126 : vector<16xf32> to vector<16x1xf32>
    %c0_36 = arith.constant 0 : index
    %c0_37 = arith.constant 0 : index
    %128 = vector.load %arg8[%c0_36, %c0_37] : memref<1x1xf32, #tpu.memory_space<vmem>>, vector<1x1xf32>
    %129 = vector.broadcast %128 : vector<1x1xf32> to vector<16x1xf32>
    %130 = arith.addf %127, %129 : vector<16x1xf32>
    %cst_38 = arith.constant 5.000000e-01 : f32
    %131 = vector.broadcast %cst_38 : f32 to vector<16x1xf32>
    %132 = arith.mulf %131, %130 : vector<16x1xf32>
    %133 = math.tanh %132 : vector<16x1xf32>
    %cst_39 = arith.constant 1.000000e+00 : f32
    %134 = vector.broadcast %cst_39 : f32 to vector<16x1xf32>
    %135 = arith.addf %133, %134 : vector<16x1xf32>
    %cst_40 = arith.constant 5.000000e-01 : f32
    %136 = vector.broadcast %cst_40 : f32 to vector<16x1xf32>
    %137 = arith.mulf %136, %135 : vector<16x1xf32>
    %c0_41 = arith.constant 0 : index
    %c0_42 = arith.constant 0 : index
    %138 = vector.load %arg9[%c0_41, %c0_42] : memref<16x1xf32, #tpu.memory_space<vmem>>, vector<16x1xf32>
    tpu.vector_store %arg9[%c0_41, %c0_42], %137 {strides = array<i32>} : memref<16x1xf32, #tpu.memory_space<vmem>>, vector<16x1xf32>,
    return
  }
}

</mosaic_0001>

<bundles_post_ra>
// kernel: temp_att_net_forward.1
= control target key start
LH: loop header
LB: loop body
LE: loop exit
PB: predicated region body
PF: predicated region fallthrough
CT: control target
= control target key end

     0   :  { %vm53_vm0 = vcmask 130048   ;;  %v759_v12 = vmov 0.0   ;;  %v36_v14 = vlaneseq  ;;  %vm87_vm2 = vcmask 523264   ;;  %s1113_s1 = inlined_call_operand.vmem [shape: f32[16,64], index: 1, kind: input, shape index: {}]   ;;  %s1114_s2 = inlined_call_operand.vmem [shape: f32[64,64], index: 2, kind: input, shape index: {}]   ;;  %s1115_s0 = inlined_call_operand.vmem [shape: f32[16,16], index: 0, kind: input, shape index: {}]   ;;  %s1116_s3 = inlined_call_operand.vmem [shape: f32[1,64], index: 3, kind: input, shape index: {}]   ;;  %s1117_s6 = inlined_call_operand.vmem [shape: f32[1,64], index: 6, kind: input, shape index: {}]   ;;  %s1118_s4 = inlined_call_operand.vmem [shape: f32[64,64], index: 4, kind: input, shape index: {}]   ;;  %s1119_s5 = inlined_call_operand.vmem [shape: f32[64,64], index: 5, kind: input, shape index: {}]   ;;  %s1120_s7 = inlined_call_operand.vmem [shape: f32[1,64], index: 7, kind: input, shape index: {}]   ;;  %s1121_s8 = inlined_call_operand.<no memory space> [shape: f32[1,1], index: 8, kind: input, shape index: {}]   ;;  %s1122_s9 = inlined_call_operand.vmem [shape: f32[16,1], index: 9, kind: output, shape index: {}]  }
   0x1   :  { %v40_v0 = vld [vmem:[%s1113_s1 + $0x8] sm:$0xff]  ;;  %v48_v1 = vld [vmem:[%s1114_s2 + $0x38] sm:$0xff]  ;;  %v39_v2 = vld [vmem:[%s1113_s1] sm:$0xff]  ;;  %vm321_vm3 = vcmask 1041408   ;;  %vm323_vm4 = vcmask 1043456   ;;  %vm325_vm5 = vcmask 1045504  }
   0x2   :  { %74 = vmatpush.msra.mxu0 %v40_v0  ;;  %99 = vmatpush.msra.mxu1 %v48_v1  ;;  %v34_v3 = vld [vmem:[%s1115_s0] sm:$0xff]  ;;  %v47_v4 = vld [vmem:[%s1114_s2 + $0x30] sm:$0xff]  ;;  %v828_v5 = vld [vmem:[%s1114_s2 + $0x28] sm:$0xff]  ;;  %v862_v16 = vand.u32 127, %v36_v14  ;;  %vm693_vm6 = vcmask 7168  }
   0x3   :  { %127 = vmatpush.msra.mxu2 %v48_v1  ;;  %156 = vmatpush.msra.mxu3 %v48_v1  ;;  %v45_v6 = vld [vmem:[%s1114_s2 + $0x20] sm:$0xff]  ;;  %v44_v7 = vld [vmem:[%s1114_s2 + $0x18] sm:$0xff]  ;;  %v43_v8 = vld [vmem:[%s1114_s2 + $0x10] sm:$0xff] }
   0x4   :  { %75 = vmatpush.msra.mxu0 %v39_v2  ;;  %100 = vmatpush.msra.mxu1 %v47_v4  ;;  %v35_v9 = vld [vmem:[%s1115_s0 + $0x8] sm:$0xff]  ;;  %v41_v11 = vld [vmem:[%s1114_s2] sm:$0xff]  ;;  %vm38_vm1 = vcmp.lt.s32.totalorder %v862_v16, 32 }
   0x5   :  { %700 = vmatmul.msk.f32.vlgmr.msra.gmra.mxu0 %vm53_vm0, %v34_v3  ;;  %128 = vmatpush.msra.mxu2 %v47_v4  ;;  %v42_v10 = vld [vmem:[%s1114_s2 + $0x8] sm:$0xff]  ;;  %v719_v15 = vld [vmem:[%s1116_s3] ss:$0 sm:$0xff] }
   0x6   :  { %101 = vmatpush.msra.mxu1 %v828_v5  ;;  %157 = vmatpush.msra.mxu3 %v47_v4  ;;  %v355_v14 = vld [vmem:[%s1118_s4 + $0x8] sm:$0xff] }
   0x7   :  { %129 = vmatpush.msra.mxu2 %v828_v5  ;;  %185 = vmatpush.msrb.mxu0 %v48_v1 }
   0x8   :  { %102 = vmatpush.msra.mxu1 %v45_v6  ;;  %158 = vmatpush.msra.mxu3 %v828_v5 }
   0x9   :  { %130 = vmatpush.msra.mxu2 %v45_v6  ;;  %186 = vmatpush.msrb.mxu0 %v47_v4 }
   0xa   :  { %103 = vmatpush.msra.mxu1 %v44_v7  ;;  %159 = vmatpush.msra.mxu3 %v45_v6 }
   0xb   :  { %131 = vmatpush.msra.mxu2 %v44_v7  ;;  %187 = vmatpush.msrb.mxu0 %v828_v5 }
   0xc   :  { %104 = vmatpush.msra.mxu1 %v43_v8  ;;  %160 = vmatpush.msra.mxu3 %v44_v7 }
   0xd   :  { %701 = vmatmul.msk.f32.gmra.mxu0 %vm53_vm0, %v35_v9  ;;  %132 = vmatpush.msra.mxu2 %v43_v8  ;;  %v357_v9 = vld [vmem:[%s1118_s4 + $0x18] sm:$0xff] }
   0xe   :  { %105 = vmatpush.msra.mxu1 %v42_v10  ;;  %161 = vmatpush.msra.mxu3 %v43_v8 }
   0xf   :  { %133 = vmatpush.msra.mxu2 %v42_v10  ;;  %188 = vmatpush.msrb.mxu0 %v45_v6 }
  0x10   :  { %106 = vmatpush.msra.mxu1 %v41_v11  ;;  %162 = vmatpush.msra.mxu3 %v42_v10 }
  0x11   :  { %107 = vmatmul.f32.vlgmr.msra.gmra.mxu1 %v759_v12  ;;  %134 = vmatpush.msra.mxu2 %v41_v11 }
  0x12   :  { %163 = vmatpush.msra.mxu3 %v41_v11  ;;  %189 = vmatpush.msrb.mxu0 %v44_v7 }
  0x13   :  { %218 = vmatpush.msrb.mxu1 %v48_v1  ;;  %246 = vmatpush.msrb.mxu2 %v48_v1 }
  0x14   :  { %190 = vmatpush.msrb.mxu0 %v43_v8  ;;  %275 = vmatpush.msrb.mxu3 %v48_v1 }
  0x15   :  { %219 = vmatpush.msrb.mxu1 %v47_v4  ;;  %247 = vmatpush.msrb.mxu2 %v47_v4 }
  0x16   :  { %191 = vmatpush.msrb.mxu0 %v42_v10  ;;  %276 = vmatpush.msrb.mxu3 %v47_v4 }
  0x17   :  { %220 = vmatpush.msrb.mxu1 %v828_v5  ;;  %248 = vmatpush.msrb.mxu2 %v828_v5 }
  0x18   :  { %192 = vmatpush.msrb.mxu0 %v41_v11  ;;  %277 = vmatpush.msrb.mxu3 %v828_v5 }
  0x19   :  { %221 = vmatpush.msrb.mxu1 %v45_v6  ;;  %249 = vmatpush.msrb.mxu2 %v45_v6 }
  0x1a   :  { %278 = vmatpush.msrb.mxu3 %v45_v6  ;;  %304 = vmatpush.msra.mxu0 %v48_v1 }
  0x1b   :  { %222 = vmatpush.msrb.mxu1 %v44_v7  ;;  %250 = vmatpush.msrb.mxu2 %v44_v7 }
  0x1c   :  { %279 = vmatpush.msrb.mxu3 %v44_v7  ;;  %305 = vmatpush.msra.mxu0 %v47_v4  ;;  %v361_v4 = vld [vmem:[%s1118_s4 + $0x38] sm:$0xff] }
  0x1d   :  { %223 = vmatpush.msrb.mxu1 %v43_v8  ;;  %251 = vmatpush.msrb.mxu2 %v43_v8 }
  0x1e   :  { %280 = vmatpush.msrb.mxu3 %v43_v8  ;;  %306 = vmatpush.msra.mxu0 %v828_v5  ;;  %v360_v5 = vld [vmem:[%s1118_s4 + $0x30] sm:$0xff] }
  0x1f   :  { %224 = vmatpush.msrb.mxu1 %v42_v10  ;;  %252 = vmatpush.msrb.mxu2 %v42_v10 }
  0x20   :  { %281 = vmatpush.msrb.mxu3 %v42_v10  ;;  %307 = vmatpush.msra.mxu0 %v45_v6  ;;  %v359_v6 = vld [vmem:[%s1118_s4 + $0x28] sm:$0xff] }
  0x21   :  { %225 = vmatpush.msrb.mxu1 %v41_v11  ;;  %253 = vmatpush.msrb.mxu2 %v41_v11 }
  0x22   :  { %282 = vmatpush.msrb.mxu3 %v41_v11  ;;  %308 = vmatpush.msra.mxu0 %v44_v7  ;;  %v358_v7 = vld [vmem:[%s1118_s4 + $0x20] sm:$0xff] }
  0x23   :  { %388 = vmatpush.msra.mxu1 %v361_v4 }
  0x24   :  { %309 = vmatpush.msra.mxu0 %v43_v8  ;;  %v927_v8 = vld [vmem:[%s1119_s5 + $0x38] sm:$0xff] }
  0x25   :  { %389 = vmatpush.msra.mxu1 %v360_v5 }
  0x26   :  { %310 = vmatpush.msra.mxu0 %v42_v10  ;;  %v937_v10 = vld [vmem:[%s1119_s5 + $0x30] sm:$0xff] }
  0x27   :  { %390 = vmatpush.msra.mxu1 %v359_v6 }
  0x28   :  { %311 = vmatpush.msra.mxu0 %v41_v11  ;;  %v356_v11 = vld [vmem:[%s1118_s4 + $0x10] sm:$0xff] }
  0x29   :  { %391 = vmatpush.msra.mxu1 %v358_v7 }
  0x2b   :  { %392 = vmatpush.msra.mxu1 %v357_v9 }
  0x2d   :  { %393 = vmatpush.msra.mxu1 %v356_v11 }
  0x2f   :  { %394 = vmatpush.msra.mxu1 %v355_v14 }
  0x82   :  { %v77_v13 = vpop.f32.mrf.mxu0 }
  0x83   :  { %v78_v17 = vadd.f32 %v719_v15, %v77_v13  ;;  %v947_v13 = vld [vmem:[%s1119_s5 + $0x28] sm:$0xff] }
  0x85   :  { %v203_v20 = vrot.slane %v78_v17, 6  ;;  %v232_v21 = vrot.slane %v78_v17, 2 }
  0x8a   :  { %v80_v18 = vpop.f32.mrf.mxu0 }
  0x8b   :  { %v81_v19 = vadd.f32 %v719_v15, %v80_v18  ;;  %v956_v15 = vld [vmem:[%s1119_s5 + $0x20] sm:$0xff]  ;;  %v970_v18 = vld [vmem:[%s1119_s5 + $0x18] sm:$0xff] }
  0x8d   :  { %v84_v22 = vrot.slane %v81_v19, 6  ;;  %v113_v23 = vrot.slane %v81_v19, 2  ;;  %v205_v24 = vsel %vm38_vm1, %v81_v19, %v203_v20  ;;  %v869_v25 = vsel %vm38_vm1, %v81_v19, %v232_v21  ;;  %v977_v19 = vld [vmem:[%s1119_s5 + $0x10] sm:$0xff]  ;;  %v983_v20 = vld [vmem:[%s1119_s5 + $0x8] sm:$0xff]  ;;  %v992_v21 = vld [vmem:[%s1119_s5] sm:$0xff] }
  0x8e   :  { %v108_v26 = vpop.f32.mrf.mxu1 }
  0x8f   :  { %v86_v27 = vsel %vm38_vm1, %v78_v17, %v84_v22  ;;  %v115_v28 = vsel %vm38_vm1, %v78_v17, %v113_v23  ;;  %v354_v17 = vld [vmem:[%s1118_s4] sm:$0xff] }
  0x90   :  { %v111_v29 = vadd.f32 %v108_v26, %v86_v27  ;;  %395 = vmatpush.msra.mxu1 %v354_v17 }
  0x92   :  { %723 = vtanh.f32 %v111_v29 }
  0x98   :  { %v875_v30 = vpop.eup %723 }
  0x99   :  { %702 = vmatmul.msk.f32.vlgmr.msra.gmra.mxu2 %vm87_vm2, %v875_v30 }
  0x9a   :  { %415 = vmatpush.msra.mxu2 %v927_v8 }
  0x9c   :  { %416 = vmatpush.msra.mxu2 %v937_v10 }
  0x9e   :  { %417 = vmatpush.msra.mxu2 %v947_v13 }
  0xa0   :  { %418 = vmatpush.msra.mxu2 %v956_v15 }
  0xa2   :  { %419 = vmatpush.msra.mxu2 %v970_v18 }
  0xa4   :  { %420 = vmatpush.msra.mxu2 %v977_v19 }
  0xa6   :  { %421 = vmatpush.msra.mxu2 %v983_v20 }
  0xa8   :  { %422 = vmatpush.msra.mxu2 %v992_v21 }
 0x11c   :  { %v136_v31 = vpop.f32.mrf.mxu2 }
 0x11d   :  { %v140_v32 = vrot.slane %v136_v31, 6 }
 0x11f   :  { %v142_v33 = vadd.f32 %v140_v32, %v115_v28 }
 0x121   :  { %725 = vtanh.f32 %v142_v33 }
 0x127   :  { %v726_v34 = vpop.eup %725 }
 0x128   :  { %v145_v35 = vrot.slane %v726_v34, 2  ;;  %v322_v40 = vsel %vm321_vm3, %v875_v30, %v726_v34  ;;  %v342_v50 = vrot.slane %v726_v34, 6 }
 0x12a   :  { %703 = vmatmul.msk.f32.vlgmr.msra.gmra.mxu3 %vm87_vm2, %v145_v35 }
 0x12b   :  { %443 = vmatpush.msra.mxu3 %v927_v8 }
 0x12d   :  { %444 = vmatpush.msra.mxu3 %v937_v10 }
 0x12f   :  { %445 = vmatpush.msra.mxu3 %v947_v13 }
 0x131   :  { %446 = vmatpush.msra.mxu3 %v956_v15 }
 0x133   :  { %447 = vmatpush.msra.mxu3 %v970_v18 }
 0x135   :  { %448 = vmatpush.msra.mxu3 %v977_v19 }
 0x137   :  { %449 = vmatpush.msra.mxu3 %v983_v20 }
 0x139   :  { %450 = vmatpush.msra.mxu3 %v992_v21 }
 0x1ad   :  { %v165_v36 = vpop.f32.mrf.mxu3 }
 0x1ae   :  { %v169_v37 = vrot.slane %v165_v36, 4 }
 0x1b0   :  { %v171_v38 = vadd.f32 %v169_v37, %v86_v27 }
 0x1b2   :  { %727 = vtanh.f32 %v171_v38  ;;  %v720_v38 = vld [vmem:[%s1117_s6] ss:$0 sm:$0xff] }
 0x1b8   :  { %v728_v39 = vpop.eup %727 }
 0x1b9   :  { %v174_v41 = vrot.slane %v728_v39, 4  ;;  %v324_v42 = vsel %vm323_vm4, %v322_v40, %v728_v39  ;;  %v340_v49 = vrot.slane %v728_v39, 2 }
 0x1bb   :  { %704 = vmatmul.msk.f32.vlgmr.msrb.gmra.mxu0 %vm87_vm2, %v174_v41 }
 0x1bc   :  { %472 = vmatpush.msrb.mxu0 %v927_v8 }
 0x1be   :  { %473 = vmatpush.msrb.mxu0 %v937_v10 }
 0x1c0   :  { %474 = vmatpush.msrb.mxu0 %v947_v13 }
 0x1c2   :  { %475 = vmatpush.msrb.mxu0 %v956_v15 }
 0x1c4   :  { %476 = vmatpush.msrb.mxu0 %v970_v18 }
 0x1c6   :  { %477 = vmatpush.msrb.mxu0 %v977_v19 }
 0x1c8   :  { %478 = vmatpush.msrb.mxu0 %v983_v20 }
 0x1ca   :  { %479 = vmatpush.msrb.mxu0 %v992_v21 }
 0x238   :  { %v194_v43 = vpop.f32.mrf.mxu0 }
 0x239   :  { %v198_v44 = vrot.slane %v194_v43, 2 }
 0x23b   :  { %v200_v45 = vadd.f32 %v198_v44, %v115_v28 }
 0x23d   :  { %729 = vtanh.f32 %v200_v45 }
 0x243   :  { %v730_v46 = vpop.eup %729 }
 0x244   :  { %v207_v47 = vrot.slane %v730_v46, 6  ;;  %v885_v48 = vsel %vm325_vm5, %v324_v42, %v730_v46 }
 0x246   :  { %705 = vmatmul.msk.f32.vlgmr.msrb.gmra.mxu1 %vm87_vm2, %v207_v47  ;;  %v349_v51 = vsel %vm321_vm3, %v207_v47, %v340_v49 }
 0x247   :  { %v890_v52 = vsel %vm323_vm4, %v349_v51, %v342_v50  ;;  %501 = vmatpush.msrb.mxu1 %v927_v8 }
 0x249   :  { %502 = vmatpush.msrb.mxu1 %v937_v10 }
 0x24b   :  { %503 = vmatpush.msrb.mxu1 %v947_v13 }
 0x24d   :  { %504 = vmatpush.msrb.mxu1 %v956_v15 }
 0x24f   :  { %505 = vmatpush.msrb.mxu1 %v970_v18 }
 0x251   :  { %506 = vmatpush.msrb.mxu1 %v977_v19 }
 0x253   :  { %507 = vmatpush.msrb.mxu1 %v983_v20 }
 0x255   :  { %508 = vmatpush.msrb.mxu1 %v992_v21 }
 0x2c3   :  { %v227_v53 = vpop.f32.mrf.mxu1 }
 0x2c4   :  { %v230_v54 = vadd.f32 %v227_v53, %v205_v24 }
 0x2c6   :  { %731 = vtanh.f32 %v230_v54 }
 0x2cc   :  { %v892_v55 = vpop.eup %731 }
 0x2cd   :  { %706 = vmatmul.msk.f32.vlgmr.msrb.gmra.mxu2 %vm87_vm2, %v892_v55  ;;  %v337_v33 = vrot.slane %v892_v55, 2 }
 0x2ce   :  { %534 = vmatpush.msrb.mxu2 %v927_v8 }
 0x2d0   :  { %535 = vmatpush.msrb.mxu2 %v937_v10 }
 0x2d2   :  { %536 = vmatpush.msrb.mxu2 %v947_v13 }
 0x2d4   :  { %537 = vmatpush.msrb.mxu2 %v956_v15 }
 0x2d5   :  { %423 = vmatmul.f32.vlgmr.msra.gmra.mxu2 %v759_v12 }
 0x2d6   :  { %538 = vmatpush.msrb.mxu2 %v970_v18 }
 0x2d8   :  { %539 = vmatpush.msrb.mxu2 %v977_v19 }
 0x2da   :  { %540 = vmatpush.msrb.mxu2 %v983_v20 }
 0x2dc   :  { %541 = vmatpush.msrb.mxu2 %v992_v21 }
 0x350   :  { %v255_v56 = vpop.f32.mrf.mxu2 }
 0x351   :  { %v259_v57 = vrot.slane %v255_v56, 6 }
 0x353   :  { %v261_v58 = vadd.f32 %v259_v57, %v869_v25 }
 0x355   :  { %733 = vtanh.f32 %v261_v58 }
 0x358   :  { %v424_v45 = vpop.f32.mrf.mxu2 }
 0x35b   :  { %v897_v59 = vpop.eup %733 }
 0x35c   :  { %v264_v60 = vrot.slane %v897_v59, 2  ;;  %v327_v1 = vsel %vm321_vm3, %v892_v55, %v897_v59  ;;  %v335_v31 = vrot.slane %v897_v59, 6 }
 0x35e   :  { %707 = vmatmul.msk.f32.vlgmr.msrb.gmra.mxu3 %vm87_vm2, %v264_v60 }
 0x35f   :  { %562 = vmatpush.msrb.mxu3 %v927_v8 }
 0x361   :  { %563 = vmatpush.msrb.mxu3 %v937_v10 }
 0x363   :  { %564 = vmatpush.msrb.mxu3 %v947_v13 }
 0x365   :  { %565 = vmatpush.msrb.mxu3 %v956_v15 }
 0x367   :  { %566 = vmatpush.msrb.mxu3 %v970_v18 }
 0x369   :  { %567 = vmatpush.msrb.mxu3 %v977_v19 }
 0x36b   :  { %568 = vmatpush.msrb.mxu3 %v983_v20 }
 0x36d   :  { %569 = vmatpush.msrb.mxu3 %v992_v21 }
 0x3e1   :  { %v284_v61 = vpop.f32.mrf.mxu3 }
 0x3e2   :  { %v288_v62 = vrot.slane %v284_v61, 4 }
 0x3e4   :  { %v290_v63 = vadd.f32 %v288_v62, %v205_v24  ;;  %v344_v24 = vrot.slane %v875_v30, 2 }
 0x3e6   :  { %735 = vtanh.f32 %v290_v63  ;;  %v351_v29 = vsel %vm325_vm5, %v890_v52, %v344_v24 }
 0x3ec   :  { %v901_v0 = vpop.eup %735 }
 0x3ed   :  { %v293_v2 = vrot.slane %v901_v0, 4  ;;  %v909_v3 = vsel %vm323_vm4, %v327_v1, %v901_v0  ;;  %v333_v27 = vrot.slane %v901_v0, 2 }
 0x3ef   :  { %708 = vmatmul.msk.f32.vlgmr.msra.gmra.mxu0 %vm87_vm2, %v293_v2 }
 0x3f0   :  { %591 = vmatpush.msra.mxu0 %v927_v8 }
 0x3f2   :  { %592 = vmatpush.msra.mxu0 %v937_v10 }
 0x3f4   :  { %593 = vmatpush.msra.mxu0 %v947_v13 }
 0x3f6   :  { %594 = vmatpush.msra.mxu0 %v956_v15 }
 0x3f8   :  { %595 = vmatpush.msra.mxu0 %v970_v18 }
 0x3fa   :  { %596 = vmatpush.msra.mxu0 %v977_v19 }
 0x3fc   :  { %597 = vmatpush.msra.mxu0 %v983_v20 }
 0x3fe   :  { %598 = vmatpush.msra.mxu0 %v992_v21 }
 0x46c   :  { %v313_v12 = vpop.f32.mrf.mxu0 }
 0x46d   :  { %v317_v22 = vrot.slane %v313_v12, 2 }
 0x46f   :  { %v319_v23 = vadd.f32 %v317_v22, %v869_v25 }
 0x471   :  { %737 = vtanh.f32 %v319_v23 }
 0x477   :  { %v738_v25 = vpop.eup %737 }
 0x478   :  { %v331_v26 = vrot.slane %v738_v25, 6  ;;  %v329_v28 = vsel %vm325_vm5, %v909_v3, %v738_v25 }
 0x479   :  { %v353_v32 = vsel %vm38_vm1, %v329_v28, %v351_v29 }
 0x47a   :  { %v346_v34 = vsel %vm321_vm3, %v331_v26, %v333_v27  ;;  %v14_v27 = vstv %s1121_s8 }
 0x47b   :  { %v347_v30 = vsel %vm323_vm4, %v346_v34, %v335_v31  ;;  %15 = vst [vmem:[#allocation2] sm:$0x1] %v14_v27 }
 0x47c   :  { %v348_v35 = vsel %vm325_vm5, %v347_v30, %v337_v33 }
 0x47d   :  { %v352_v36 = vsel %vm38_vm1, %v885_v48, %v348_v35 }
 0x47e   :  { %709 = vmatmul.msk.f32.vlgmr.msra.gmra.mxu1 %vm87_vm2, %v352_v36 }
 0x47f   :  { %620 = vmatpush.msra.mxu1 %v927_v8 }
 0x481   :  { %621 = vmatpush.msra.mxu1 %v937_v10 }
 0x483   :  { %622 = vmatpush.msra.mxu1 %v947_v13 }
 0x485   :  { %623 = vmatpush.msra.mxu1 %v956_v15 }
 0x486   :  { %710 = vmatmul.msk.f32.gmra.mxu1 %vm87_vm2, %v353_v32 }
 0x487   :  { %624 = vmatpush.msra.mxu1 %v970_v18 }
 0x489   :  { %625 = vmatpush.msra.mxu1 %v977_v19 }
 0x48b   :  { %626 = vmatpush.msra.mxu1 %v983_v20 }
 0x48d   :  { %627 = vmatpush.msra.mxu1 %v992_v21 }
 0x4fb   :  { %v397_v37 = vpop.f32.mrf.mxu1 }
 0x4fc   :  { %v398_v39 = vadd.f32 %v720_v38, %v397_v37 }
 0x4fe   :  { %v519_v42 = vrot.slane %v398_v39, 6  ;;  %v548_v43 = vrot.slane %v398_v39, 2 }
 0x503   :  { %v400_v40 = vpop.f32.mrf.mxu1 }
 0x504   :  { %v401_v41 = vadd.f32 %v720_v38, %v400_v40 }
 0x506   :  { %v404_v44 = vrot.slane %v401_v41, 6  ;;  %v429_v46 = vrot.slane %v401_v41, 2  ;;  %v521_v47 = vsel %vm38_vm1, %v401_v41, %v519_v42  ;;  %v550_v48 = vsel %vm38_vm1, %v401_v41, %v548_v43  ;;  %v721_v43 = vld [vmem:[%s1120_s7] ss:$0 sm:$0xff] }
 0x508   :  { %v406_v49 = vsel %vm38_vm1, %v398_v39, %v404_v44  ;;  %v431_v50 = vsel %vm38_vm1, %v398_v39, %v429_v46 }
 0x509   :  { %v427_v51 = vadd.f32 %v424_v45, %v406_v49 }
 0x50b   :  { %739 = vtanh.f32 %v427_v51 }
 0x511   :  { %v1071_v52 = vpop.eup %739 }
 0x512   :  { %711 = vmatmul.msk.f32.vlgmr.msra.gmra.mxu3 %vm87_vm2, %v1071_v52  ;;  %v657_v32 = vrot.slane %v1071_v52, 2 }
 0x595   :  { %v452_v53 = vpop.f32.mrf.mxu3 }
 0x596   :  { %v456_v54 = vrot.slane %v452_v53, 6 }
 0x598   :  { %v458_v55 = vadd.f32 %v456_v54, %v431_v50 }
 0x59a   :  { %741 = vtanh.f32 %v458_v55 }
 0x5a0   :  { %v742_v56 = vpop.eup %741 }
 0x5a1   :  { %v461_v57 = vrot.slane %v742_v56, 2  ;;  %v637_v62 = vsel %vm321_vm3, %v1071_v52, %v742_v56  ;;  %v655_v8 = vrot.slane %v742_v56, 6 }
 0x5a3   :  { %712 = vmatmul.msk.f32.vlgmr.msrb.gmra.mxu0 %vm87_vm2, %v461_v57 }
 0x620   :  { %v481_v58 = vpop.f32.mrf.mxu0 }
 0x621   :  { %v485_v59 = vrot.slane %v481_v58, 4 }
 0x623   :  { %v487_v60 = vadd.f32 %v485_v59, %v406_v49  ;;  %v722_v49 = vld [vmem:[#allocation2] ss:$0 sm:$0xff] }
 0x625   :  { %743 = vtanh.f32 %v487_v60 }
 0x62b   :  { %v744_v61 = vpop.eup %743 }
 0x62c   :  { %v490_v63 = vrot.slane %v744_v61, 4  ;;  %v638_v0 = vsel %vm323_vm4, %v637_v62, %v744_v61  ;;  %v653_v7 = vrot.slane %v744_v61, 2 }
 0x62e   :  { %713 = vmatmul.msk.f32.vlgmr.msrb.gmra.mxu1 %vm87_vm2, %v490_v63 }
 0x6ab   :  { %v510_v1 = vpop.f32.mrf.mxu1 }
 0x6ac   :  { %v514_v2 = vrot.slane %v510_v1, 2 }
 0x6ae   :  { %v516_v3 = vadd.f32 %v514_v2, %v431_v50 }
 0x6b0   :  { %745 = vtanh.f32 %v516_v3 }
 0x6b6   :  { %v746_v4 = vpop.eup %745 }
 0x6b7   :  { %v523_v5 = vrot.slane %v746_v4, 6  ;;  %v639_v6 = vsel %vm325_vm5, %v638_v0, %v746_v4 }
 0x6b9   :  { %714 = vmatmul.msk.f32.vlgmr.msrb.gmra.mxu2 %vm87_vm2, %v523_v5  ;;  %v662_v9 = vsel %vm321_vm3, %v523_v5, %v653_v7 }
 0x6ba   :  { %v663_v10 = vsel %vm323_vm4, %v662_v9, %v655_v8 }
 0x6bb   :  { %v664_v36 = vsel %vm325_vm5, %v663_v10, %v657_v32 }
 0x73c   :  { %v543_v11 = vpop.f32.mrf.mxu2 }
 0x73d   :  { %v546_v13 = vadd.f32 %v543_v11, %v521_v47 }
 0x73f   :  { %747 = vtanh.f32 %v546_v13 }
 0x745   :  { %v748_v14 = vpop.eup %747 }
 0x746   :  { %715 = vmatmul.msk.f32.vlgmr.msrb.gmra.mxu3 %vm87_vm2, %v748_v14  ;;  %v650_v39 = vrot.slane %v748_v14, 2 }
 0x7c9   :  { %v571_v15 = vpop.f32.mrf.mxu3 }
 0x7ca   :  { %v575_v17 = vrot.slane %v571_v15, 6 }
 0x7cc   :  { %v577_v18 = vadd.f32 %v575_v17, %v550_v48 }
 0x7ce   :  { %749 = vtanh.f32 %v577_v18 }
 0x7d4   :  { %v750_v19 = vpop.eup %749 }
 0x7d5   :  { %v580_v20 = vrot.slane %v750_v19, 2  ;;  %v640_v24 = vsel %vm321_vm3, %v748_v14, %v750_v19  ;;  %v648_v37 = vrot.slane %v750_v19, 6 }
 0x7d7   :  { %716 = vmatmul.msk.f32.vlgmr.msra.gmra.mxu0 %vm87_vm2, %v580_v20 }
 0x854   :  { %v600_v21 = vpop.f32.mrf.mxu0 }
 0x855   :  { %v604_v12 = vrot.slane %v600_v21, 4 }
 0x857   :  { %v606_v22 = vadd.f32 %v604_v12, %v521_v47 }
 0x859   :  { %751 = vtanh.f32 %v606_v22 }
 0x85f   :  { %v752_v23 = vpop.eup %751 }
 0x860   :  { %v609_v25 = vrot.slane %v752_v23, 4  ;;  %v641_v26 = vsel %vm323_vm4, %v640_v24, %v752_v23  ;;  %v646_v30 = vrot.slane %v752_v23, 2 }
 0x862   :  { %717 = vmatmul.msk.f32.vlgmr.msra.gmra.mxu1 %vm87_vm2, %v609_v25 }
 0x8df   :  { %v629_v28 = vpop.f32.mrf.mxu1 }
 0x8e0   :  { %v633_v29 = vrot.slane %v629_v28, 2 }
 0x8e2   :  { %v635_v31 = vadd.f32 %v633_v29, %v550_v48 }
 0x8e4   :  { %753 = vtanh.f32 %v635_v31 }
 0x8ea   :  { %v754_v33 = vpop.eup %753 }
 0x8eb   :  { %v644_v34 = vrot.slane %v754_v33, 6  ;;  %v642_v35 = vsel %vm325_vm5, %v641_v26, %v754_v33 }
 0x8ec   :  { %v666_v38 = vsel %vm38_vm1, %v642_v35, %v664_v36 }
 0x8ed   :  { %v659_v40 = vsel %vm321_vm3, %v644_v34, %v646_v30  ;;  %v672_v47 = vmul.f32 %v721_v43, %v666_v38 }
 0x8ee   :  { %v660_v41 = vsel %vm323_vm4, %v659_v40, %v648_v37 }
 0x8ef   :  { %v661_v42 = vsel %vm325_vm5, %v660_v41, %v650_v39  ;;  %v676_v48 = vsel %vm87_vm2, %v672_v47, 0.0 }
 0x8f0   :  { %v665_v44 = vsel %vm38_vm1, %v639_v6, %v661_v42 }
 0x8f1   :  { %v671_v45 = vmul.f32 %v721_v43, %v665_v44 }
 0x8f3   :  { %v673_v46 = vsel %vm87_vm2, %v671_v45, 0.0 }
 0x8f4   :  { %674 = vadd.xlane.f32.xlu0 %v673_v46 }
 0x8fc   :  { %677 = vadd.xlane.f32.xlu0 %v676_v48 }
 0x967   :  { %v675_v50 = vpop.xlane.xlu0 %674 }
 0x968   :  { %v683_v51 = vadd.f32 %v722_v49, %v675_v50 }
 0x96a   :  { %v685_v52 = vmul.f32 0.5, %v683_v51 }
 0x96c   :  { %755 = vtanh.f32 %v685_v52 }
 0x96f   :  { %v678_v53 = vpop.xlane.xlu0 %677 }
 0x970   :  { %v684_v54 = vadd.f32 %v722_v49, %v678_v53 }
 0x972   :  { %v756_v55 = vpop.eup %755  ;;  %v686_v56 = vmul.f32 0.5, %v684_v54 }
 0x973   :  { %v689_v57 = vadd.f32 1.0, %v756_v55 }
 0x974   :  { %757 = vtanh.f32 %v686_v56 }
 0x975   :  { %v691_v16 = vmul.f32 0.5, %v689_v57 }
 0x977   :  { %694 = vst.msk [vmem:[%s1122_s9] sm:$0xff] %vm693_vm6, %v691_v16 }
 0x97a   :  { %v758_v58 = vpop.eup %757 }
 0x97b   :  { %v690_v59 = vadd.f32 1.0, %v758_v58 }
 0x97d   :  { %v692_v60 = vmul.f32 0.5, %v690_v59 }
 0x97f   :  { %695 = vst.msk [vmem:[%s1122_s9 + $0x8] sm:$0xff] %vm693_vm6, %v692_v60 }

</bundles_post_ra>
